<compile_context>
chip_gen: v7x
topology: tpu7x:2x2x1
jax: 0.10.0
libtpu: 0.0.40
codegen_flags: <defaults>
</compile_context>

<pallas_src>
import jax
import jax.numpy as jnp
from jax.experimental import pallas as pl
from jax.experimental.pallas import tpu as pltpu


def _round_up(n, m):
    return ((n + m - 1) // m) * m


def _pick_block_h(hh, block_h):
    """Largest multiple of 128 that divides hh and is <= block_h; else hh (resident)."""
    if hh <= block_h:
        return hh
    th = (min(block_h, hh) // 128) * 128
    while th >= 128:
        if hh % th == 0:
            return th
        th -= 128
    return hh


def _vmem_limit_bytes():
    # ~80% of the per-core VMEM capacity (v5e/v6e: 128 MiB -> ~102 MiB,
    # v7x: 64 MiB -> ~51 MiB), leaving headroom for Mosaic internal scratch.
    try:
        cap = pltpu.get_tpu_info().vmem_capacity_bytes
        return max(32 * 1024 * 1024, int(cap * 0.8))
    except Exception:
        return 48 * 1024 * 1024


def glu_mlp_kernel(x_ref, w1v_ref, w1g_ref, b1v_ref, b1g_ref, w2_ref, b2_ref,
                   o_ref, acc_ref):
    # Grid: (token blocks [parallel], hidden blocks [arbitrary / reduction]).
    # x_ref:   (TM, F)
    # w1v_ref: (F, TH)  b1v_ref: (1, TH)   -> value half of fc1 (pre-transposed)
    # w1g_ref: (F, TH)  b1g_ref: (1, TH)   -> gate half of fc1 (pre-transposed)
    # w2_ref:  (TH, O)  b2_ref:  (1, O)    -> fc2 (pre-transposed)
    # o_ref:   (TM, O)  acc_ref: (TM, O) f32 scratch
    h = pl.program_id(1)

    @pl.when(h == 0)
    def _init():
        acc_ref[...] = jnp.zeros_like(acc_ref)

    # Feed the MXU both operands in the *weight* dtype (bf16 weights -> bf16 x);
    # accumulate in f32 via preferred_element_type.  No-op when dtypes already match.
    x = x_ref[...].astype(w1v_ref.dtype)

    v = jnp.dot(x, w1v_ref[...], preferred_element_type=jnp.float32) + b1v_ref[...]
    g = jnp.dot(x, w1g_ref[...], preferred_element_type=jnp.float32) + b1g_ref[...]

    gated = (v * jax.nn.sigmoid(g)).astype(w2_ref.dtype)   # GLU gating, sigmoid in f32

    acc_ref[...] += jnp.dot(gated, w2_ref[...], preferred_element_type=jnp.float32)

    @pl.when(h == pl.num_programs(1) - 1)
    def _finalize():
        o_ref[...] = (acc_ref[...] + b2_ref[...]).astype(o_ref.dtype)


def glu_mlp(x, w1, b1, w2, b2, *, block_m=256, block_h=512):
    """GLU MLP forward.

    x : (..., F)
    w1: (H, F), b1: (H,)        -- fc1 (H must be even)
    w2: (O, H//2), b2: (O,)     -- fc2
    """
    orig_shape = x.shape
    F = orig_shape[-1]
    H = w1.shape[0]
    assert H % 2 == 0, "hidden_features must be even for GLU"
    Hh = H // 2
    O = w2.shape[0]
    assert w1.shape[1] == F and w2.shape[1] == Hh

    xm = x.reshape(-1, F)
    M = xm.shape[0]

    # fc1 split into value / gate halves and pre-transposed to (in, out) layout so
    # both matmuls contract last-with-first on the MXU.  One-time layout prep; in a
    # real model the weights would be stored this way.
    w1v_t = w1[:Hh].T              # (F, Hh)
    w1g_t = w1[Hh:].T              # (F, Hh)
    w2_t = w2.T                    # (Hh, O)
    b1v = b1[:Hh].reshape(1, Hh)
    b1g = b1[Hh:].reshape(1, Hh)
    b2r = b2.reshape(1, O)

    # Token tile: multiple of the sublane packing of the activation dtype
    # (8 for f32, 16 for bf16); capped at block_m.  No padding copy of x is made:
    # the ragged last block is masked by Pallas.
    sub = max(8, 32 // xm.dtype.itemsize)
    tm = _round_up(min(block_m, _round_up(M, sub)), sub)
    grid_m = pl.cdiv(M, tm)

    # Hidden tile: stream Hh in lane-aligned blocks when it is large (overlaps weight
    # DMA with MXU work, bounds weight VMEM on v7x); otherwise keep weights resident.
    th = _pick_block_h(Hh, block_h)
    grid_h = Hh // th
    resident = grid_h == 1

    x_spec = pl.BlockSpec((tm, F), lambda i, h: (i, 0))
    if resident:
        # Whole-array VMEM operands: single copy, no 2x double-buffered footprint.
        w_specs = [pl.BlockSpec(memory_space=pltpu.MemorySpace.VMEM) for _ in range(5)]
    else:
        w_specs = [
            pl.BlockSpec((F, th), lambda i, h: (0, h)),   # W1 value half (transposed)
            pl.BlockSpec((F, th), lambda i, h: (0, h)),   # W1 gate half (transposed)
            pl.BlockSpec((1, th), lambda i, h: (0, h)),   # b1 value half
            pl.BlockSpec((1, th), lambda i, h: (0, h)),   # b1 gate half
            pl.BlockSpec((th, O), lambda i, h: (h, 0)),   # W2 (transposed)
        ]
    b2_spec = pl.BlockSpec(memory_space=pltpu.MemorySpace.VMEM)   # tiny, always resident

    out = pl.pallas_call(
        glu_mlp_kernel,
        out_shape=jax.ShapeDtypeStruct((M, O), x.dtype),
        grid_spec=pltpu.PrefetchScalarGridSpec(
            num_scalar_prefetch=0,
            grid=(grid_m, grid_h),
            in_specs=[x_spec] + w_specs + [b2_spec],
            out_specs=pl.BlockSpec((tm, O), lambda i, h: (i, 0)),
            scratch_shapes=[pltpu.VMEM((tm, O), jnp.float32)],
        ),
        compiler_params=pltpu.CompilerParams(
            dimension_semantics=("parallel", "arbitrary"),   # token blocks shard over TCs
            vmem_limit_bytes=_vmem_limit_bytes(),
        ),
    )(xm, w1v_t, w1g_t, b1v, b1g, w2_t, b2r)

    return out.reshape(orig_shape[:-1] + (O,))


def glu_mlp_ref(x, w1, b1, w2, b2):
    h = x @ w1.T + b1
    half = h.shape[-1] // 2
    v, g = h[..., :half], h[..., half:]
    return (v * jax.nn.sigmoid(g)) @ w2.T + b2


if __name__ == "__main__":
    # Small shapes consistent with the module:
    # batch=2, seq=8, in_features=128, hidden_features=256 (even), out_features=128.
    B, S, F = 2, 8, 128
    H, O = 256, 128

    key = jax.random.PRNGKey(0)
    kx, k1, k2, k3, k4 = jax.random.split(key, 5)

    x = jax.random.normal(kx, (B, S, F), dtype=jnp.float32)
    w1 = jax.random.normal(k1, (H, F), dtype=jnp.float32) * (1.0 / F) ** 0.5
    b1 = jax.random.normal(k2, (H,), dtype=jnp.float32) * 0.01
    w2 = jax.random.normal(k3, (O, H // 2), dtype=jnp.float32) * (2.0 / H) ** 0.5
    b2 = jax.random.normal(k4, (O,), dtype=jnp.float32) * 0.01

    # f32 path.
    y = jax.block_until_ready(glu_mlp(x, w1, b1, w2, b2))
    y_ref = glu_mlp_ref(x, w1, b1, w2, b2)
    assert y.shape == (B, S, O)
    assert jnp.allclose(y, y_ref, atol=1e-4, rtol=1e-4)

    # bf16 path: both MXU operands bf16, f32 accumulation in-kernel.
    xb, w1b, b1b, w2b, b2b = (a.astype(jnp.bfloat16) for a in (x, w1, b1, w2, b2))
    yb = jax.block_until_ready(glu_mlp(xb, w1b, b1b, w2b, b2b))
    yb_ref = glu_mlp_ref(xb.astype(jnp.float32), w1b.astype(jnp.float32),
                         b1b.astype(jnp.float32), w2b.astype(jnp.float32),
                         b2b.astype(jnp.float32))
    assert yb.shape == (B, S, O)
    assert jnp.allclose(yb.astype(jnp.float32), yb_ref, atol=5e-2, rtol=5e-2)

    # Ragged token count (no jnp.pad copy; Pallas masks the tail block).
    xr = jax.random.normal(kx, (3, 7, F), dtype=jnp.float32)
    yr = jax.block_until_ready(glu_mlp(xr, w1, b1, w2, b2))
    yr_ref = glu_mlp_ref(xr, w1, b1, w2, b2)
    assert yr.shape == (3, 7, O)
    assert jnp.allclose(yr, yr_ref, atol=1e-4, rtol=1e-4)

    print("KERNEL_OK")
</pallas_src>

<mosaic_0001>
module attributes {stable_mosaic.version = 11 : i64} {
  func.func @glu_mlp_kernel(%arg0: i32, %arg1: i32, %arg2: memref<16x128xf32, #tpu.memory_space<vmem>>, %arg3: memref<128x128xf32, #tpu.memory_space<vmem>>, %arg4: memref<128x128xf32, #tpu.memory_space<vmem>>, %arg5: memref<1x128xf32, #tpu.memory_space<vmem>>, %arg6: memref<1x128xf32, #tpu.memory_space<vmem>>, %arg7: memref<128x128xf32, #tpu.memory_space<vmem>>, %arg8: memref<1x128xf32, #tpu.memory_space<vmem>>, %arg9: memref<16x128xf32, #tpu.memory_space<vmem>>, %arg10: memref<16x128xf32, #tpu.memory_space<vmem>>) attributes {dimension_semantics = [#tpu.dimension_semantics<parallel>, #tpu.dimension_semantics<arbitrary>], iteration_bounds = array<i64: 1, 1>, scalar_prefetch = 0 : i64, scratch_operands = 1 : i64, tpu.core_type = #tpu.core_type<tc>, window_params = [{transform_indices = @transform_0, window_bounds = array<i64: 16, 128>}, {pipeline_mode = #tpu.pipeline_mode<synchronous>, transform_indices = @transform_1, window_bounds = array<i64: 128, 128>}, {pipeline_mode = #tpu.pipeline_mode<synchronous>, transform_indices = @transform_2, window_bounds = array<i64: 128, 128>}, {pipeline_mode = #tpu.pipeline_mode<synchronous>, transform_indices = @transform_3, window_bounds = array<i64: 1, 128>}, {pipeline_mode = #tpu.pipeline_mode<synchronous>, transform_indices = @transform_4, window_bounds = array<i64: 1, 128>}, {pipeline_mode = #tpu.pipeline_mode<synchronous>, transform_indices = @transform_5, window_bounds = array<i64: 128, 128>}, {pipeline_mode = #tpu.pipeline_mode<synchronous>, transform_indices = @transform_6, window_bounds = array<i64: 1, 128>}, {transform_indices = @transform_7, window_bounds = array<i64: 16, 128>}]} {
    %c0_i32 = arith.constant 0 : i32
    %0 = arith.cmpi eq, %arg1, %c0_i32 : i32
    %1 = arith.extui %0 : i1 to i32
    %c0_i32_0 = arith.constant 0 : i32
    %2 = arith.cmpi ne, %1, %c0_i32_0 : i32
    scf.if %2 {
      %cst_21 = arith.constant 0.000000e+00 : f32
      %28 = vector.broadcast %cst_21 : f32 to vector<16x128xf32>
      %c0_22 = arith.constant 0 : index
      %c0_23 = arith.constant 0 : index
      %29 = vector.load %arg10[%c0_22, %c0_23] : memref<16x128xf32, #tpu.memory_space<vmem>>, vector<16x128xf32>
      tpu.vector_store %arg10[%c0_22, %c0_23], %28 {strides = array<i32>} : memref<16x128xf32, #tpu.memory_space<vmem>>, vector<16x128xf32>,
    } else {
    }
    %c0 = arith.constant 0 : index
    %c0_1 = arith.constant 0 : index
    %3 = vector.load %arg2[%c0, %c0_1] : memref<16x128xf32, #tpu.memory_space<vmem>>, vector<16x128xf32>
    %c0_2 = arith.constant 0 : index
    %c0_3 = arith.constant 0 : index
    %4 = vector.load %arg3[%c0_2, %c0_3] : memref<128x128xf32, #tpu.memory_space<vmem>>, vector<128x128xf32>
    %cst = arith.constant dense<0.000000e+00> : vector<16x128xf32>
    %5 = tpu.matmul %3, %4, %cst {dimension_numbers = #tpu.dot_dimension_numbers<[1], [0], [0], [1], [0, 0, 1, 1], [], []>} : vector<16x128xf32>, vector<128x128xf32>, vector<16x128xf32> -> vector<16x128xf32>
    %c0_4 = arith.constant 0 : index
    %c0_5 = arith.constant 0 : index
    %6 = vector.load %arg5[%c0_4, %c0_5] : memref<1x128xf32, #tpu.memory_space<vmem>>, vector<1x128xf32>
    %7 = vector.broadcast %6 : vector<1x128xf32> to vector<16x128xf32>
    %8 = arith.addf %5, %7 : vector<16x128xf32>
    %c0_6 = arith.constant 0 : index
    %c0_7 = arith.constant 0 : index
    %9 = vector.load %arg4[%c0_6, %c0_7] : memref<128x128xf32, #tpu.memory_space<vmem>>, vector<128x128xf32>
    %cst_8 = arith.constant dense<0.000000e+00> : vector<16x128xf32>
    %10 = tpu.matmul %3, %9, %cst_8 {dimension_numbers = #tpu.dot_dimension_numbers<[1], [0], [0], [1], [0, 0, 1, 1], [], []>} : vector<16x128xf32>, vector<128x128xf32>, vector<16x128xf32> -> vector<16x128xf32>
    %c0_9 = arith.constant 0 : index
    %c0_10 = arith.constant 0 : index
    %11 = vector.load %arg6[%c0_9, %c0_10] : memref<1x128xf32, #tpu.memory_space<vmem>>, vector<1x128xf32>
    %12 = vector.broadcast %11 : vector<1x128xf32> to vector<16x128xf32>
    %13 = arith.addf %10, %12 : vector<16x128xf32>
    %14 = arith.negf %13 : vector<16x128xf32>
    %15 = math.exp %14 : vector<16x128xf32>
    %cst_11 = arith.constant 1.000000e+00 : f32
    %16 = vector.broadcast %cst_11 : f32 to vector<16x128xf32>
    %17 = arith.addf %16, %15 : vector<16x128xf32>
    %18 = arith.divf %16, %17 : vector<16x128xf32>
    %19 = arith.mulf %8, %18 : vector<16x128xf32>
    %c0_12 = arith.constant 0 : index
    %c0_13 = arith.constant 0 : index
    %20 = vector.load %arg10[%c0_12, %c0_13] : memref<16x128xf32, #tpu.memory_space<vmem>>, vector<16x128xf32>
    %c0_14 = arith.constant 0 : index
    %c0_15 = arith.constant 0 : index
    %21 = vector.load %arg7[%c0_14, %c0_15] : memref<128x128xf32, #tpu.memory_space<vmem>>, vector<128x128xf32>
    %cst_16 = arith.constant dense<0.000000e+00> : vector<16x128xf32>
    %22 = tpu.matmul %19, %21, %cst_16 {dimension_numbers = #tpu.dot_dimension_numbers<[1], [0], [0], [1], [0, 0, 1, 1], [], []>} : vector<16x128xf32>, vector<128x128xf32>, vector<16x128xf32> -> vector<16x128xf32>
    %23 = arith.addf %20, %22 : vector<16x128xf32>
    %c0_17 = arith.constant 0 : index
    %c0_18 = arith.constant 0 : index
    %24 = vector.load %arg10[%c0_17, %c0_18] : memref<16x128xf32, #tpu.memory_space<vmem>>, vector<16x128xf32>
    tpu.vector_store %arg10[%c0_17, %c0_18], %23 {strides = array<i32>} : memref<16x128xf32, #tpu.memory_space<vmem>>, vector<16x128xf32>,
    %c0_i32_19 = arith.constant 0 : i32
    %25 = arith.cmpi eq, %arg1, %c0_i32_19 : i32
    %26 = arith.extui %25 : i1 to i32
    %c0_i32_20 = arith.constant 0 : i32
    %27 = arith.cmpi ne, %26, %c0_i32_20 : i32
    scf.if %27 {
      %c0_21 = arith.constant 0 : index
      %c0_22 = arith.constant 0 : index
      %28 = vector.load %arg10[%c0_21, %c0_22] : memref<16x128xf32, #tpu.memory_space<vmem>>, vector<16x128xf32>
      %c0_23 = arith.constant 0 : index
      %c0_24 = arith.constant 0 : index
      %29 = vector.load %arg8[%c0_23, %c0_24] : memref<1x128xf32, #tpu.memory_space<vmem>>, vector<1x128xf32>
      %30 = vector.broadcast %29 : vector<1x128xf32> to vector<16x128xf32>
      %31 = arith.addf %28, %30 : vector<16x128xf32>
      %c0_25 = arith.constant 0 : index
      %c0_26 = arith.constant 0 : index
      %32 = vector.load %arg9[%c0_25, %c0_26] : memref<16x128xf32, #tpu.memory_space<vmem>>, vector<16x128xf32>
      tpu.vector_store %arg9[%c0_25, %c0_26], %31 {strides = array<i32>} : memref<16x128xf32, #tpu.memory_space<vmem>>, vector<16x128xf32>,
    } else {
    }
    return
  }
  func.func @transform_0(%arg0: i32, %arg1: i32) -> (i32, i32) {
    %c0_i32 = arith.constant 0 : i32
    %c0_i32_0 = arith.constant 0 : i32
    return %arg0, %c0_i32 : i32, i32
  }
  func.func @transform_1(%arg0: i32, %arg1: i32) -> (i32, i32) {
    %c0_i32 = arith.constant 0 : i32
    %c0_i32_0 = arith.constant 0 : i32
    %c0_i32_1 = arith.constant 0 : i32
    return %c0_i32, %c0_i32_0 : i32, i32
  }
  func.func @transform_2(%arg0: i32, %arg1: i32) -> (i32, i32) {
    %c0_i32 = arith.constant 0 : i32
    %c0_i32_0 = arith.constant 0 : i32
    %c0_i32_1 = arith.constant 0 : i32
    return %c0_i32, %c0_i32_0 : i32, i32
  }
  func.func @transform_3(%arg0: i32, %arg1: i32) -> (i32, i32) {
    %c0_i32 = arith.constant 0 : i32
    %c0_i32_0 = arith.constant 0 : i32
    %c0_i32_1 = arith.constant 0 : i32
    return %c0_i32, %c0_i32_0 : i32, i32
  }
  func.func @transform_4(%arg0: i32, %arg1: i32) -> (i32, i32) {
    %c0_i32 = arith.constant 0 : i32
    %c0_i32_0 = arith.constant 0 : i32
    %c0_i32_1 = arith.constant 0 : i32
    return %c0_i32, %c0_i32_0 : i32, i32
  }
  func.func @transform_5(%arg0: i32, %arg1: i32) -> (i32, i32) {
    %c0_i32 = arith.constant 0 : i32
    %c0_i32_0 = arith.constant 0 : i32
    %c0_i32_1 = arith.constant 0 : i32
    return %c0_i32, %c0_i32_0 : i32, i32
  }
  func.func @transform_6(%arg0: i32, %arg1: i32) -> (i32, i32) {
    %c0_i32 = arith.constant 0 : i32
    %c0_i32_0 = arith.constant 0 : i32
    %c0_i32_1 = arith.constant 0 : i32
    return %c0_i32, %c0_i32_0 : i32, i32
  }
  func.func @transform_7(%arg0: i32, %arg1: i32) -> (i32, i32) {
    %c0_i32 = arith.constant 0 : i32
    %c0_i32_0 = arith.constant 0 : i32
    return %arg0, %c0_i32 : i32, i32
  }
}

</mosaic_0001>

<bundles_post_ra>
// kernel: tpu_custom_call.1
= control target key start
LH: loop header
LB: loop body
LE: loop exit
PB: predicated region body
PF: predicated region fallthrough
CT: control target
= control target key end

     0   :  { %12 = vsyncpa [#allocation4], 0  ;;  %s970_s0 = inlined_call_operand.hbm [shape: f32[16,128], index: 0, kind: input, shape index: {}]   ;;  %s971_s1 = inlined_call_operand.hbm [shape: f32[128,128], index: 1, kind: input, shape index: {}]   ;;  %s972_s2 = inlined_call_operand.hbm [shape: f32[128,128], index: 2, kind: input, shape index: {}]   ;;  %s973_s3 = inlined_call_operand.vmem [shape: f32[1,128], index: 3, kind: input, shape index: {}]   ;;  %s974_s4 = inlined_call_operand.vmem [shape: f32[1,128], index: 4, kind: input, shape index: {}]   ;;  %s975_s5 = inlined_call_operand.hbm [shape: f32[128,128], index: 5, kind: input, shape index: {}]   ;;  %s976_s6 = inlined_call_operand.vmem [shape: f32[1,128], index: 6, kind: input, shape index: {}]   ;;  %s977_s7 = inlined_call_operand.hbm [shape: f32[16,128], index: 7, kind: output, shape index: {}]  }
   0x1   :  { %13 = vsyncpa [#allocation7], 0 }
   0x2   :  { %14 = vsyncpa [#allocation10], 0 }
   0x3   :  { %15 = vsyncpa [#allocation5], 0  ;;  %s825_s24 = smov [#allocation6]   ;;  %s826_s26 = smov [#allocation3]  }
   0x4   :  { %s33_s25 = sshll.u32 %s825_s24, 4  ;;  %s21_s27 = sshll.u32 %s826_s26, 4  ;;  %s34_s25 = int_to_ptr.vmem [resolvable:$true] %s33_s25  ;;  %s872_s27 = int_to_ptr.vmem [resolvable:$true] %s21_s27 }
   0x5   :  { %s707_s30 = scalar_lea.hbm %s971_s1, 2048 }
   0x6   :  { %p708_p0 = scmp.ne.s32.totalorder %s971_s1, %s707_s30  ;;  %p711_p1 = scmp.lt.u32.totalorder %s707_s30, %s971_s1 }
   0x8   :  { %p713_p2 = pnand %p711_p1, %p708_p0 }
   0xa   :  { %716 = shalt.err (!%p713_p2)
}
   0xb   :  { %s717_s12 = scalar_lea.vmem %s34_s25, 2048  ;;  %p722_p4 = scmp.lt.s32.totalorder %s34_s25, %s34_s25 }
   0xc   :  { %p718_p3 = scmp.ne.s32.totalorder %s34_s25, %s717_s12  ;;  %p723_p5 = scmp.lt.s32.totalorder %s717_s12, %s717_s12 }
   0xe   :  { %p724_p6 = por %p723_p5, %p722_p4 }
  0x10   :  { %p725_p7 = pnand %p724_p6, %p718_p3 }
  0x12   :  { %728 = shalt.err (!%p725_p7)
}
  0x13   :  { %s827_s13 = smov 128   ;;  %s828_s14 = smov 8  }
  0x14   :  { %39 = dma.hbm_to_vmem [thread:$0]  %s971_s1, 2048, %s34_s25, [#allocation7], %s827_s13, %s827_s13, %s828_s14  }
  0x15   :  { %s729_s19 = scalar_lea.hbm %s970_s0, 256 }
  0x16   :  { %p730_p8 = scmp.ne.s32.totalorder %s970_s0, %s729_s19  ;;  %p733_p9 = scmp.lt.u32.totalorder %s729_s19, %s970_s0 }
  0x18   :  { %p735_p10 = pnand %p733_p9, %p730_p8 }
  0x1a   :  { %738 = shalt.err (!%p735_p10)
}
  0x1b   :  { %s739_s24 = scalar_lea.vmem %s872_s27, 256  ;;  %p744_p12 = scmp.lt.s32.totalorder %s872_s27, %s872_s27 }
  0x1c   :  { %p740_p11 = scmp.ne.s32.totalorder %s872_s27, %s739_s24  ;;  %p745_p13 = scmp.lt.s32.totalorder %s739_s24, %s739_s24 }
  0x1e   :  { %p746_p0 = por %p745_p13, %p744_p12 }
  0x20   :  { %p747_p1 = pnand %p746_p0, %p740_p11 }
  0x22   :  { %750 = shalt.err (!%p747_p1)
}
  0x23   :  { %27 = dma.hbm_to_vmem [thread:$0]  %s970_s0, 256, %s872_s27, [#allocation4], %s827_s13, %s827_s13, %s828_s14  }
  0x24   :  { %s829_s26 = smov [#allocation8]   ;;  %s830_s29 = smov [#allocation9]  }
  0x25   :  { %s45_s28 = sshll.u32 %s829_s26, 4  ;;  %s61_s30 = sshll.u32 %s830_s29, 4  ;;  %s46_s28 = int_to_ptr.vmem [resolvable:$true] %s45_s28  ;;  %s909_s30 = int_to_ptr.vmem [resolvable:$true] %s61_s30 }
  0x26   :  { %s751_s10 = scalar_lea.hbm %s972_s2, 2048 }
  0x27   :  { %p752_p2 = scmp.ne.s32.totalorder %s972_s2, %s751_s10  ;;  %p755_p3 = scmp.lt.u32.totalorder %s751_s10, %s972_s2 }
  0x29   :  { %p757_p4 = pnand %p755_p3, %p752_p2 }
  0x2b   :  { %760 = shalt.err (!%p757_p4)
}
  0x2c   :  { %s761_s0 = scalar_lea.vmem %s46_s28, 2048  ;;  %p766_p6 = scmp.lt.s32.totalorder %s46_s28, %s46_s28 }
  0x2d   :  { %p762_p5 = scmp.ne.s32.totalorder %s46_s28, %s761_s0  ;;  %p767_p7 = scmp.lt.s32.totalorder %s761_s0, %s761_s0 }
  0x2f   :  { %p768_p8 = por %p767_p7, %p766_p6 }
  0x31   :  { %p769_p9 = pnand %p768_p8, %p762_p5 }
  0x33   :  { %772 = shalt.err (!%p769_p9)
}
  0x34   :  { %51 = dma.hbm_to_vmem [thread:$0]  %s972_s2, 2048, %s46_s28, [#allocation7], %s827_s13, %s827_s13, %s828_s14  }
  0x35   :  { %s773_s20 = scalar_lea.hbm %s975_s5, 2048 }
  0x36   :  { %p774_p10 = scmp.ne.s32.totalorder %s975_s5, %s773_s20  ;;  %p777_p11 = scmp.lt.u32.totalorder %s773_s20, %s975_s5 }
  0x38   :  { %p779_p12 = pnand %p777_p11, %p774_p10 }
  0x3a   :  { %782 = shalt.err (!%p779_p12)
}
  0x3b   :  { %s783_s1 = scalar_lea.vmem %s909_s30, 2048  ;;  %p788_p0 = scmp.lt.s32.totalorder %s909_s30, %s909_s30 }
  0x3c   :  { %p784_p13 = scmp.ne.s32.totalorder %s909_s30, %s783_s1  ;;  %p789_p1 = scmp.lt.s32.totalorder %s783_s1, %s783_s1 }
  0x3e   :  { %p790_p2 = por %p789_p1, %p788_p0 }
  0x40   :  { %p791_p3 = pnand %p790_p2, %p784_p13 }
  0x42   :  { %794 = shalt.err (!%p791_p3)
}
  0x43   :  { %67 = dma.hbm_to_vmem [thread:$0]  %s975_s5, 2048, %s909_s30, [#allocation10], %s827_s13, %s827_s13, %s828_s14  }
  0x44   :  { %817 = dma.done.wait [#allocation4], 256  }
  0x45   :  { %818 = vsyncadd [#allocation4], 4294967040 }
  0x46   :  { %819 = dma.done.wait [#allocation7], 4096  }
  0x47   :  { %820 = vsyncadd [#allocation7], 4294963200 }
  0x48   :  { %821 = dma.done.wait [#allocation10], 2048  }
  0x49   :  { %822 = vsyncadd [#allocation10], 4294965248  ;;  %v188_v0 = vld [vmem:[#allocation8] sm:$0xff]  ;;  %v189_v1 = vld [vmem:[#allocation8 + $0x8] sm:$0xff]  ;;  %s831_s8 = smov [#allocation11]  }
  0x4a   :  { %v190_v2 = vld [vmem:[#allocation8 + $0x10] sm:$0xff]  ;;  %v628_v3 = vpack.c.bf16 %v189_v1, %v188_v0  ;;  %v191_v4 = vld [vmem:[#allocation8 + $0x18] sm:$0xff]  ;;  %v192_v6 = vld [vmem:[#allocation8 + $0x20] sm:$0xff]  ;;  %s418_s9 = sshll.u32 %s831_s8, 4  ;;  %s419_s9 = int_to_ptr.vmem [resolvable:$true] %s418_s9 }
  0x4b   :  { %v632_v5 = vpack.c.bf16 %v191_v4, %v190_v2  ;;  %v193_v7 = vld [vmem:[#allocation8 + $0x28] sm:$0xff]  ;;  %v90_v8 = vld [vmem:[#allocation6] sm:$0xff]  ;;  %v194_v10 = vld [vmem:[#allocation8 + $0x30] sm:$0xff]  ;;  %p800_p5 = scmp.lt.s32.totalorder %s419_s9, %s419_s9 }
  0x4c   :  { %629 = vmatprep.subr.bf16.mxu1 %v628_v3  ;;  %v636_v9 = vpack.c.bf16 %v193_v7, %v192_v6  ;;  %v195_v11 = vld [vmem:[#allocation8 + $0x38] sm:$0xff]  ;;  %v91_v12 = vld [vmem:[#allocation6 + $0x8] sm:$0xff]  ;;  %v92_v14 = vld [vmem:[#allocation6 + $0x10] sm:$0xff] }
  0x4d   :  { %631 = vmatpush3.bf16.msra.mxu1 %v628_v3  ;;  %v596_v13 = vpack.c.bf16 %v91_v12, %v90_v8  ;;  %v93_v15 = vld [vmem:[#allocation6 + $0x18] sm:$0xff]  ;;  %v88_v16 = vld [vmem:[#allocation3] sm:$0xff]  ;;  %v94_v18 = vld [vmem:[#allocation6 + $0x20] sm:$0xff]  ;;  %v640_v20 = vpack.c.bf16 %v195_v11, %v194_v10 }
  0x4e   :  { %633 = vmatprep.subr.bf16.mxu1 %v632_v5  ;;  %v600_v17 = vpack.c.bf16 %v93_v15, %v92_v14  ;;  %558 = vmatprep.mubr.f32.mxu1 %v88_v16  ;;  %v95_v19 = vld [vmem:[#allocation6 + $0x28] sm:$0xff]  ;;  %v196_v21 = vld [vmem:[#allocation8 + $0x40] sm:$0xff]  ;;  %v96_v24 = vld [vmem:[#allocation6 + $0x30] sm:$0xff] }
  0x4f   :  { %523 = vmatprep.mubr.f32.mxu0 %v88_v16  ;;  %597 = vmatprep.subr.bf16.mxu0 %v596_v13  ;;  %v197_v22 = vld [vmem:[#allocation8 + $0x48] sm:$0xff]  ;;  %v604_v23 = vpack.c.bf16 %v95_v19, %v94_v18  ;;  %v97_v25 = vld [vmem:[#allocation6 + $0x38] sm:$0xff]  ;;  %v198_v27 = vld [vmem:[#allocation8 + $0x50] sm:$0xff] }
  0x50   :  { %599 = vmatpush3.bf16.msra.mxu0 %v596_v13  ;;  %v644_v26 = vpack.c.bf16 %v197_v22, %v196_v21  ;;  %v199_v28 = vld [vmem:[#allocation8 + $0x58] sm:$0xff]  ;;  %v608_v29 = vpack.c.bf16 %v97_v25, %v96_v24  ;;  %v98_v30 = vld [vmem:[#allocation6 + $0x40] sm:$0xff]  ;;  %v99_v31 = vld [vmem:[#allocation6 + $0x48] sm:$0xff] }
  0x51   :  { %635 = vmatpush3.bf16.msra.mxu1 %v632_v5  ;;  %601 = vmatprep.subr.bf16.mxu0 %v600_v17  ;;  %v648_v32 = vpack.c.bf16 %v199_v28, %v198_v27  ;;  %v200_v33 = vld [vmem:[#allocation8 + $0x60] sm:$0xff]  ;;  %v201_v34 = vld [vmem:[#allocation8 + $0x68] sm:$0xff]  ;;  %v612_v35 = vpack.c.bf16 %v99_v31, %v98_v30  ;;  %v100_v36 = vld [vmem:[#allocation6 + $0x50] sm:$0xff] }
  0x52   :  { %637 = vmatprep.subr.bf16.mxu1 %v636_v9  ;;  %v101_v37 = vld [vmem:[#allocation6 + $0x58] sm:$0xff]  ;;  %v652_v38 = vpack.c.bf16 %v201_v34, %v200_v33  ;;  %v202_v39 = vld [vmem:[#allocation8 + $0x70] sm:$0xff]  ;;  %v102_v42 = vld [vmem:[#allocation6 + $0x60] sm:$0xff] }
  0x53   :  { %v203_v40 = vld [vmem:[#allocation8 + $0x78] sm:$0xff]  ;;  %v616_v41 = vpack.c.bf16 %v101_v37, %v100_v36  ;;  %v103_v43 = vld [vmem:[#allocation6 + $0x68] sm:$0xff]  ;;  %v104_v46 = vld [vmem:[#allocation6 + $0x70] sm:$0xff] }
  0x54   :  { %603 = vmatpush3.bf16.msra.mxu0 %v600_v17  ;;  %v656_v44 = vpack.c.bf16 %v203_v40, %v202_v39  ;;  %v620_v45 = vpack.c.bf16 %v103_v43, %v102_v42  ;;  %v105_v47 = vld [vmem:[#allocation6 + $0x78] sm:$0xff]  ;;  %v302_v50 = vld [vmem:[#allocation9] sm:$0xff]  ;;  %v303_v51 = vld [vmem:[#allocation9 + $0x8] sm:$0xff] }
  0x55   :  { %639 = vmatpush3.bf16.msra.mxu1 %v636_v9  ;;  %605 = vmatprep.subr.bf16.mxu0 %v604_v23  ;;  %v624_v48 = vpack.c.bf16 %v105_v47, %v104_v46  ;;  %v89_v49 = vld [vmem:[#allocation3 + $0x8] sm:$0xff]  ;;  %v660_v52 = vpack.c.bf16 %v303_v51, %v302_v50  ;;  %v304_v53 = vld [vmem:[#allocation9 + $0x10] sm:$0xff]  ;;  %v306_v56 = vld [vmem:[#allocation9 + $0x20] sm:$0xff] }
  0x56   :  { %641 = vmatprep.subr.bf16.mxu1 %v640_v20  ;;  %v305_v54 = vld [vmem:[#allocation9 + $0x18] sm:$0xff]  ;;  %v307_v57 = vld [vmem:[#allocation9 + $0x28] sm:$0xff]  ;;  %v308_v59 = vld [vmem:[#allocation9 + $0x30] sm:$0xff] }
  0x57   :  { %v664_v55 = vpack.c.bf16 %v305_v54, %v304_v53  ;;  %v668_v58 = vpack.c.bf16 %v307_v57, %v306_v56  ;;  %v309_v60 = vld [vmem:[#allocation9 + $0x38] sm:$0xff]  ;;  %v310_v62 = vld [vmem:[#allocation9 + $0x40] sm:$0xff]  ;;  %v311_v63 = vld [vmem:[#allocation9 + $0x48] sm:$0xff] }
  0x58   :  { %607 = vmatpush3.bf16.msra.mxu0 %v604_v23  ;;  %v672_v61 = vpack.c.bf16 %v309_v60, %v308_v59  ;;  %v676_v0 = vpack.c.bf16 %v311_v63, %v310_v62  ;;  %v312_v1 = vld [vmem:[#allocation9 + $0x50] sm:$0xff]  ;;  %v313_v2 = vld [vmem:[#allocation9 + $0x58] sm:$0xff]  ;;  %v314_v4 = vld [vmem:[#allocation9 + $0x60] sm:$0xff] }
  0x59   :  { %643 = vmatpush3.bf16.msra.mxu1 %v640_v20  ;;  %609 = vmatprep.subr.bf16.mxu0 %v608_v29  ;;  %v680_v3 = vpack.c.bf16 %v313_v2, %v312_v1  ;;  %v315_v5 = vld [vmem:[#allocation9 + $0x68] sm:$0xff]  ;;  %v316_v7 = vld [vmem:[#allocation9 + $0x70] sm:$0xff]  ;;  %v317_v8 = vld [vmem:[#allocation9 + $0x78] sm:$0xff] }
  0x5a   :  { %645 = vmatprep.subr.bf16.mxu1 %v644_v26  ;;  %v684_v6 = vpack.c.bf16 %v315_v5, %v314_v4  ;;  %v688_v9 = vpack.c.bf16 %v317_v8, %v316_v7  ;;  %v433_v10 = vld [vmem:[%s974_s4] ss:$0 sm:$0xff] }
  0x5b   :  { %v432_v23 = vld [vmem:[%s973_s3] ss:$0 sm:$0xff]  ;;  %s795_s3 = scalar_lea.vmem %s419_s9, 256 }
  0x5c   :  { %611 = vmatpush3.bf16.msra.mxu0 %v608_v29  ;;  %v436_v30 = vld [vmem:[%s976_s6] ss:$0 sm:$0xff]  ;;  %p796_p4 = scmp.ne.s32.totalorder %s419_s9, %s795_s3  ;;  %p801_p6 = scmp.lt.s32.totalorder %s795_s3, %s795_s3 }
  0x5d   :  { %647 = vmatpush3.bf16.msra.mxu1 %v644_v26  ;;  %613 = vmatprep.subr.bf16.mxu0 %v612_v35 }
  0x5e   :  { %649 = vmatprep.subr.bf16.mxu1 %v648_v32  ;;  %p802_p7 = por %p801_p6, %p800_p5 }
  0x60   :  { %615 = vmatpush3.bf16.msra.mxu0 %v612_v35  ;;  %p803_p8 = pnand %p802_p7, %p796_p4 }
  0x61   :  { %651 = vmatpush3.bf16.msra.mxu1 %v648_v32  ;;  %617 = vmatprep.subr.bf16.mxu0 %v616_v41 }
  0x62   :  { %653 = vmatprep.subr.bf16.mxu1 %v652_v38 }
  0x64   :  { %619 = vmatpush3.bf16.msra.mxu0 %v616_v41 }
  0x65   :  { %655 = vmatpush3.bf16.msra.mxu1 %v652_v38  ;;  %621 = vmatprep.subr.bf16.mxu0 %v620_v45 }
  0x66   :  { %657 = vmatprep.subr.bf16.mxu1 %v656_v44 }
  0x68   :  { %623 = vmatpush3.bf16.msra.mxu0 %v620_v45 }
  0x69   :  { %659 = vmatpush3.bf16.msra.mxu1 %v656_v44  ;;  %625 = vmatprep.subr.bf16.mxu0 %v624_v48 }
  0x6c   :  { %559 = vmatmul.mubr.f32.vlgmr.msra.gmra.mrb[0].mxu1 %v89_v49  ;;  %627 = vmatpush3.bf16.msra.mxu0 %v624_v48 }
  0x6d   :  { %661 = vmatprep.subr.bf16.mxu0 %v660_v52 }
  0x6f   :  { %524 = vmatmul.mubr.f32.vlgmr.msra.gmra.mrb[0].mxu0 %v89_v49 }
  0x70   :  { %663 = vmatpush3.bf16.msra.mxu0 %v660_v52 }
  0x71   :  { %665 = vmatprep.subr.bf16.mxu0 %v664_v55 }
  0x74   :  { %667 = vmatpush3.bf16.msra.mxu0 %v664_v55 }
  0x75   :  { %669 = vmatprep.subr.bf16.mxu0 %v668_v58 }
  0x78   :  { %671 = vmatpush3.bf16.msra.mxu0 %v668_v58 }
  0x79   :  { %673 = vmatprep.subr.bf16.mxu0 %v672_v61 }
  0x7c   :  { %675 = vmatpush3.bf16.msra.mxu0 %v672_v61 }
  0x7d   :  { %677 = vmatprep.subr.bf16.mxu0 %v676_v0 }
  0x80   :  { %679 = vmatpush3.bf16.msra.mxu0 %v676_v0 }
  0x81   :  { %681 = vmatprep.subr.bf16.mxu0 %v680_v3 }
  0x84   :  { %683 = vmatpush3.bf16.msra.mxu0 %v680_v3 }
  0x85   :  { %685 = vmatprep.subr.bf16.mxu0 %v684_v6 }
  0x88   :  { %687 = vmatpush3.bf16.msra.mxu0 %v684_v6 }
  0x89   :  { %689 = vmatprep.subr.bf16.mxu0 %v688_v9 }
  0x8c   :  { %691 = vmatpush3.bf16.msra.mxu0 %v688_v9 }
 0x13f   :  { %v560_v11 = vpop.f32.mrb[0].mxu1 }
 0x140   :  { %v283_v12 = vadd.f32 %v560_v11, %v433_v10  ;;  %v277_v13 = vpop.f32.mrb[1].mxu1 }
 0x141   :  { %v278_v14 = vadd.f32 %v433_v10, %v277_v13 }
 0x142   :  { %v435_v15 = vmul.f32 -1.442695, %v283_v12  ;;  %v525_v17 = vpop.f32.mrb[0].mxu0 }
 0x143   :  { %v434_v16 = vmul.f32 -1.442695, %v278_v14  ;;  %v179_v18 = vpop.f32.mrb[1].mxu0  ;;  %v185_v24 = vadd.f32 %v525_v17, %v432_v23 }
 0x144   :  { %699 = vpow2.f32 %v435_v15  ;;  %v180_v25 = vadd.f32 %v432_v23, %v179_v18 }
 0x145   :  { %701 = vpow2.f32 %v434_v16 }
 0x14e   :  { %v700_v19 = vpop.eup %699 }
 0x14f   :  { %v702_v20 = vpop.eup %701  ;;  %v293_v21 = vadd.f32 1.0, %v700_v19 }
 0x150   :  { %v292_v22 = vadd.f32 1.0, %v702_v20 }
 0x151   :  { %703 = vrcp.f32 %v293_v21 }
 0x152   :  { %705 = vrcp.f32 %v292_v22 }
 0x15b   :  { %v704_v26 = vpop.eup %703 }
 0x15c   :  { %v706_v27 = vpop.eup %705  ;;  %v299_v28 = vmul.f32 %v704_v26, %v185_v24 }
 0x15d   :  { %v298_v29 = vmul.f32 %v706_v27, %v180_v25 }
 0x15f   :  { %593 = vmatprep.mubr.f32.mxu0 %v298_v29 }
 0x160   :  { %594 = vmatmul.mubr.f32.vlgmr.msra.gmra.mrb[2].mxu0 %v299_v28 }
 0x233   :  { %v595_v31 = vpop.f32.mrb[2].mxu0 }
 0x234   :  { %v410_v32 = vadd.f32 %v595_v31, %v436_v30  ;;  %v384_v33 = vpop.f32.mrb[3].mxu0 }
 0x235   :  { %v409_v34 = vadd.f32 %v436_v30, %v384_v33 }
 0x236   :  { %412 = vst [vmem:[#allocation11 + $0x8] sm:$0xff] %v410_v32 }
 0x237   :  { %411 = vst [vmem:[#allocation11] sm:$0xff] %v409_v34 }
 0x238   :  { %806 = shalt.err (!%p803_p8)
}
 0x239   :  { %s807_s6 = scalar_lea.hbm %s977_s7, 256 }
 0x23a   :  { %p808_p9 = scmp.ne.s32.totalorder %s977_s7, %s807_s6  ;;  %p811_p10 = scmp.lt.u32.totalorder %s807_s6, %s977_s7 }
 0x23c   :  { %p813_p11 = pnand %p811_p10, %p808_p9 }
 0x23e   :  { %816 = shalt.err (!%p813_p11)
}
 0x23f   :  { %424 = dma.vmem_to_hbm [thread:$0]  %s419_s9, 256, %s977_s7, [#allocation5], %s827_s13, %s827_s13, %s828_s14  }
 0x240   :  { %823 = dma.done.wait [#allocation5], 256  }
 0x241   :  { %824 = vsyncadd [#allocation5], 4294967040 }
 0x242   :  { %428 = vsyncpa [#allocation4], 1 }
 0x243   :  { %429 = vsyncpa [#allocation7], 1 }
 0x244   :  { %430 = vsyncpa [#allocation10], 1 }
 0x245   :  { %431 = vsyncpa [#allocation5], 1 }

</bundles_post_ra>
